<compile_context>
chip_gen: v5e
topology: v5e:2x2
jax: 0.10.0
libtpu: 0.0.40
codegen_flags: <defaults>
</compile_context>

<pallas_src>
import math
import functools

import jax
import jax.numpy as jnp
from jax.experimental import pallas as pl
from jax.experimental.pallas import tpu as pltpu


def _round_up(x, m):
    return ((x + m - 1) // m) * m


def _sdpa_kernel(q_ref, k_ref, v_ref, out_ref, attn_ref, *, scale, true_t):
    """One (batch, query-tile) grid step.

    q_ref    : [tq, d]       compute dtype (bf16 by default)
    k_ref    : [t_k_pad, d]  compute dtype, resident across all query tiles
    v_ref    : [t_k_pad, d]  compute dtype, resident across all query tiles
    out_ref  : [tq, d]       input dtype
    attn_ref : [tq, t_k_pad] attn dtype (bf16 by default)
    """
    q = q_ref[...]
    # Fold the scale into the small q tile ([tq, d]) rather than the large
    # score plane ([tq, t_k_pad]).  `if scale:` (not `is not None`) mirrors the
    # PyTorch module exactly (scale=0.0 is falsy there too).
    if scale:
        q = q * jnp.asarray(scale, dtype=q.dtype)

    # Scores: contract the last dims directly -> MXU reads K in its native
    # [t_k_pad, d] layout, no in-kernel transpose / relayout of the resident K.
    s = jax.lax.dot_general(
        q, k_ref[...],
        dimension_numbers=(((1,), (1,)), ((), ())),
        preferred_element_type=jnp.float32)               # [tq, t_k_pad] f32

    # Mask padded key columns (branch only emitted when padding exists).
    t_k_pad = s.shape[-1]
    if t_k_pad > true_t:
        col = jax.lax.broadcasted_iota(jnp.int32, s.shape, 1)
        s = jnp.where(col < true_t, s, -jnp.inf)

    # Softmax over the key axis, in f32.
    m = jnp.max(s, axis=-1, keepdims=True)
    e = jnp.exp(s - m)
    denom = jnp.sum(e, axis=-1, keepdims=True)
    inv = pl.reciprocal(denom, approx=True)               # EUP slot, off the VPU

    # Single full-plane cast: the same tensor is stored as `attn` and (by
    # default attn dtype == v dtype) feeds the second matmul.
    p = (e * inv).astype(attn_ref.dtype)
    attn_ref[...] = p

    # dropout p = 0.0 -> identity

    pv = p if p.dtype == v_ref.dtype else p.astype(v_ref.dtype)
    out = jnp.dot(pv, v_ref[...], preferred_element_type=jnp.float32)  # [tq, d]
    out_ref[...] = out.astype(out_ref.dtype)


def scaled_dot_product_attention(q, k, v, scale=None, attn_mask=None, *,
                                 tile_q=256,
                                 compute_dtype=jnp.bfloat16,
                                 attn_dtype=None):
    """q, k, v: [batch, time, dim].  Returns (output [b,t,d], attn [b,t,t]).

    compute_dtype: matmul-input dtype.  Default bf16: half the HBM/VMEM bytes
      and 2x MXU throughput on v6e/v7x; both matmuls still accumulate in f32
      and the softmax/masking run in f32.  Pass jnp.float32 for bit-closer
      numerics (e.g. on v5e if exact-f32 behavior is expected).
    attn_dtype: dtype of the returned attention matrix.  Defaults to
      compute_dtype, halving the kernel's dominant HBM writeback (b*t*t).
    """
    if attn_mask is not None:
        # TODO(synk): boolean attn_mask path (masked_fill_ with -inf) not implemented.
        raise NotImplementedError("attn_mask is not supported in this kernel")

    b, t, d = q.shape
    out_dtype = q.dtype
    compute_dtype = jnp.dtype(compute_dtype) if compute_dtype is not None else jnp.dtype(out_dtype)
    attn_dtype = jnp.dtype(attn_dtype) if attn_dtype is not None else compute_dtype

    # ---- padding: key axis only to a lane multiple (128); query axis padded
    # independently, so key padding never depends on the query tile size. ----
    t_k_pad = _round_up(t, 128)
    tile_q = max(128, (tile_q // 128) * 128)

    # ---- generation-aware VMEM budget (v7x: 64 MiB/TC, v5e/v6e: 128 MiB) ----
    try:
        vmem_cap = int(pltpu.get_tpu_info().vmem_capacity_bytes)
    except Exception:
        vmem_cap = 64 << 20              # conservative fallback (v7x per-TC)
    budget = int(vmem_cap * 0.70)        # headroom for Mosaic scratch / spills

    c_bytes = compute_dtype.itemsize
    a_bytes = attn_dtype.itemsize
    o_bytes = jnp.dtype(out_dtype).itemsize
    kv_bytes = 2 * 2 * t_k_pad * d * c_bytes      # K + V, double-buffered

    def step_bytes(tq_):
        return (2 * tq_ * d * c_bytes              # q tile   (x2 buffers)
                + 2 * tq_ * d * o_bytes            # out tile (x2 buffers)
                + 2 * tq_ * t_k_pad * a_bytes      # attn tile (x2 buffers)
                + 3 * tq_ * t_k_pad * 4)           # s / e / p f32 intermediates

    if t <= tile_q and kv_bytes + step_bytes(_round_up(t, 16)) <= budget:
        tq = _round_up(t, 16)                      # single query tile, minimal padding
    else:
        # Pick the query tile (multiple of 128) that fits the VMEM budget and
        # minimizes query-axis padding; ties favor the bigger tile.
        best = None
        cand = 128
        while cand <= tile_q:
            key = (kv_bytes + step_bytes(cand) > budget, _round_up(t, cand), -cand)
            if best is None or key < best[0]:
                best = (key, cand)
            cand += 128
        tq = best[1]
    t_q_pad = _round_up(t, tq)

    def pad_time(x, tt):
        if tt == t:
            return x
        return jnp.pad(x, ((0, 0), (0, tt - t), (0, 0)))

    qp = pad_time(q, t_q_pad).astype(compute_dtype)
    kp = pad_time(k, t_k_pad).astype(compute_dtype)
    vp = pad_time(v, t_k_pad).astype(compute_dtype)

    grid = (b, t_q_pad // tq)
    kernel = functools.partial(_sdpa_kernel, scale=scale, true_t=t)

    vmem_need = kv_bytes + step_bytes(tq)
    vmem_limit = int(min(max(vmem_need + (8 << 20), 32 << 20),
                         int(vmem_cap * 0.85)))

    cost = pl.CostEstimate(
        flops=2 * 2 * b * t_q_pad * t_k_pad * d,            # two matmuls
        transcendentals=b * t_q_pad * t_k_pad,              # exp in softmax
        bytes_accessed=(qp.size + kp.size + vp.size) * c_bytes
                       + b * t_q_pad * d * o_bytes
                       + b * t_q_pad * t_k_pad * a_bytes)

    out_p, attn_p = pl.pallas_call(
        kernel,
        out_shape=(jax.ShapeDtypeStruct((b, t_q_pad, d), out_dtype),
                   jax.ShapeDtypeStruct((b, t_q_pad, t_k_pad), attn_dtype)),
        grid_spec=pltpu.PrefetchScalarGridSpec(
            num_scalar_prefetch=0,
            grid=grid,
            in_specs=[
                pl.BlockSpec((pl.Squeezed(), tq, d),
                             lambda bi, qi: (bi, qi, 0)),            # q tile
                pl.BlockSpec((pl.Squeezed(), t_k_pad, d),
                             lambda bi, qi: (bi, 0, 0)),             # K (resident per batch)
                pl.BlockSpec((pl.Squeezed(), t_k_pad, d),
                             lambda bi, qi: (bi, 0, 0)),             # V (resident per batch)
            ],
            out_specs=[
                pl.BlockSpec((pl.Squeezed(), tq, d),
                             lambda bi, qi: (bi, qi, 0)),            # out tile
                pl.BlockSpec((pl.Squeezed(), tq, t_k_pad),
                             lambda bi, qi: (bi, qi, 0)),            # attn tile
            ],
        ),
        compiler_params=pltpu.CompilerParams(
            dimension_semantics=("parallel", "parallel"),
            vmem_limit_bytes=vmem_limit),
        cost_estimate=cost,
    )(qp, kp, vp)

    # Strip time-axis padding.
    return out_p[:, :t, :], attn_p[:, :t, :t]


if __name__ == "__main__":
    # Small shapes consistent with the module's forward: q/k/v are [b, t, dim].
    # T=96 deliberately is not a multiple of 128, exercising the pad-and-mask path.
    B, T, D = 2, 96, 64

    key = jax.random.PRNGKey(0)
    kq, kk, kv = jax.random.split(key, 3)
    q = jax.random.normal(kq, (B, T, D), dtype=jnp.float32)
    k = jax.random.normal(kk, (B, T, D), dtype=jnp.float32)
    v = jax.random.normal(kv, (B, T, D), dtype=jnp.float32)
    scale = 1.0 / math.sqrt(D)

    out, attn = scaled_dot_product_attention(q, k, v, scale=scale)
    out = jax.block_until_ready(out)
    attn = jax.block_until_ready(attn)

    # Pure-JAX f32 reference (same math as the PyTorch module).
    s = jnp.einsum("btd,bsd->bts", q, k) * scale
    attn_expected = jax.nn.softmax(s, axis=2)
    out_expected = jnp.einsum("bts,bsd->btd", attn_expected, v)

    assert out.shape == (B, T, D) and attn.shape == (B, T, T)
    # bf16 matmul inputs / bf16 attn output (f32 accumulation) -> loosened tol.
    attn_f32 = attn.astype(jnp.float32)
    err_o = float(jnp.max(jnp.abs(out - out_expected)))
    err_a = float(jnp.max(jnp.abs(attn_f32 - attn_expected)))
    assert jnp.allclose(out, out_expected, atol=2e-2, rtol=2e-2), err_o
    assert jnp.allclose(attn_f32, attn_expected, atol=2e-2, rtol=2e-2), err_a

    print("KERNEL_OK")
</pallas_src>

<mosaic_0001>
module attributes {stable_mosaic.version = 11 : i64} {
  func.func @_sdpa_kernel(%arg0: i32, %arg1: i32, %arg2: memref<1x96x64xbf16, #tpu.memory_space<vmem>>, %arg3: memref<1x128x64xbf16, #tpu.memory_space<vmem>>, %arg4: memref<1x128x64xbf16, #tpu.memory_space<vmem>>, %arg5: memref<1x96x64xf32, #tpu.memory_space<vmem>>, %arg6: memref<1x96x128xbf16, #tpu.memory_space<vmem>>) attributes {dimension_semantics = [#tpu.dimension_semantics<parallel>, #tpu.dimension_semantics<parallel>], iteration_bounds = array<i64: 2, 1>, scalar_prefetch = 0 : i64, scratch_operands = 0 : i64, tpu.core_type = #tpu.core_type<tc>, window_params = [{transform_indices = @transform_0, window_bounds = array<i64: 1, 96, 64>}, {transform_indices = @transform_1, window_bounds = array<i64: 1, 128, 64>}, {transform_indices = @transform_2, window_bounds = array<i64: 1, 128, 64>}, {transform_indices = @transform_3, window_bounds = array<i64: 1, 96, 64>}, {transform_indices = @transform_4, window_bounds = array<i64: 1, 96, 128>}]} {
    %c0 = arith.constant 0 : index
    %c0_0 = arith.constant 0 : index
    %c0_1 = arith.constant 0 : index
    %0 = vector.load %arg2[%c0, %c0_0, %c0_1] : memref<1x96x64xbf16, #tpu.memory_space<vmem>>, vector<1x96x64xbf16>
    %1 = vector.shape_cast %0 : vector<1x96x64xbf16> to vector<96x64xbf16>
    %cst = arith.constant 1.250000e-01 : bf16
    %2 = vector.broadcast %cst : bf16 to vector<96x64xbf16>
    %3 = arith.mulf %1, %2 : vector<96x64xbf16>
    %c0_2 = arith.constant 0 : index
    %c0_3 = arith.constant 0 : index
    %c0_4 = arith.constant 0 : index
    %4 = vector.load %arg3[%c0_2, %c0_3, %c0_4] : memref<1x128x64xbf16, #tpu.memory_space<vmem>>, vector<1x128x64xbf16>
    %5 = vector.shape_cast %4 : vector<1x128x64xbf16> to vector<128x64xbf16>
    %cst_5 = arith.constant dense<0.000000e+00> : vector<96x128xf32>
    %6 = tpu.matmul %3, %5, %cst_5 {dimension_numbers = #tpu.dot_dimension_numbers<[1], [1], [0], [0], [0, 0, 1, 0], [], []>} : vector<96x64xbf16>, vector<128x64xbf16>, vector<96x128xf32> -> vector<96x128xf32>
    %7 = tpu.iota {dimensions = array<i32: 1>} : vector<96x128xi32>
    %c96_i32 = arith.constant 96 : i32
    %8 = vector.broadcast %c96_i32 : i32 to vector<96x128xi32>
    %9 = arith.cmpi slt, %7, %8 : vector<96x128xi32>
    %cst_6 = arith.constant 0xFF800000 : f32
    %10 = vector.broadcast %cst_6 : f32 to vector<96x128xf32>
    %11 = arith.select %9, %6, %10 : vector<96x128xi1>, vector<96x128xf32>
    %cst_7 = arith.constant dense<0xFF800000> : vector<96xf32>
    %12 = vector.multi_reduction <maximumf>, %11, %cst_7 [1] : vector<96x128xf32> to vector<96xf32>
    %13 = vector.shape_cast %12 : vector<96xf32> to vector<96x1xf32>
    %14 = vector.broadcast %13 : vector<96x1xf32> to vector<96x128xf32>
    %15 = arith.subf %11, %14 : vector<96x128xf32>
    %16 = math.exp %15 : vector<96x128xf32>
    %cst_8 = arith.constant dense<0.000000e+00> : vector<96xf32>
    %17 = vector.multi_reduction <add>, %16, %cst_8 [1] : vector<96x128xf32> to vector<96xf32>
    %18 = vector.shape_cast %17 : vector<96xf32> to vector<96x1xf32>
    %19 = tpu.reciprocal %18 {approx = true} : vector<96x1xf32> -> vector<96x1xf32>
    %20 = vector.broadcast %19 : vector<96x1xf32> to vector<96x128xf32>
    %21 = arith.mulf %16, %20 : vector<96x128xf32>
    %22 = arith.truncf %21 : vector<96x128xf32> to vector<96x128xbf16>
    %c0_9 = arith.constant 0 : index
    %c0_10 = arith.constant 0 : index
    %c0_11 = arith.constant 0 : index
    %23 = vector.load %arg6[%c0_9, %c0_10, %c0_11] : memref<1x96x128xbf16, #tpu.memory_space<vmem>>, vector<1x96x128xbf16>
    %24 = vector.shape_cast %23 : vector<1x96x128xbf16> to vector<96x128xbf16>
    %25 = vector.shape_cast %22 : vector<96x128xbf16> to vector<1x96x128xbf16>
    tpu.vector_store %arg6[%c0_9, %c0_10, %c0_11], %25 {strides = array<i32>} : memref<1x96x128xbf16, #tpu.memory_space<vmem>>, vector<1x96x128xbf16>,
    %c0_12 = arith.constant 0 : index
    %c0_13 = arith.constant 0 : index
    %c0_14 = arith.constant 0 : index
    %26 = vector.load %arg4[%c0_12, %c0_13, %c0_14] : memref<1x128x64xbf16, #tpu.memory_space<vmem>>, vector<1x128x64xbf16>
    %27 = vector.shape_cast %26 : vector<1x128x64xbf16> to vector<128x64xbf16>
    %cst_15 = arith.constant dense<0.000000e+00> : vector<96x64xf32>
    %28 = tpu.matmul %22, %27, %cst_15 {dimension_numbers = #tpu.dot_dimension_numbers<[1], [0], [0], [1], [0, 0, 1, 1], [], []>} : vector<96x128xbf16>, vector<128x64xbf16>, vector<96x64xf32> -> vector<96x64xf32>
    %c0_16 = arith.constant 0 : index
    %c0_17 = arith.constant 0 : index
    %c0_18 = arith.constant 0 : index
    %29 = vector.load %arg5[%c0_16, %c0_17, %c0_18] : memref<1x96x64xf32, #tpu.memory_space<vmem>>, vector<1x96x64xf32>
    %30 = vector.shape_cast %29 : vector<1x96x64xf32> to vector<96x64xf32>
    %31 = vector.shape_cast %28 : vector<96x64xf32> to vector<1x96x64xf32>
    tpu.vector_store %arg5[%c0_16, %c0_17, %c0_18], %31 {strides = array<i32>} : memref<1x96x64xf32, #tpu.memory_space<vmem>>, vector<1x96x64xf32>,
    return
  }
  func.func @transform_0(%arg0: i32, %arg1: i32) -> (i32, i32, i32) {
    %c0_i32 = arith.constant 0 : i32
    %c0_i32_0 = arith.constant 0 : i32
    return %arg0, %arg1, %c0_i32 : i32, i32, i32
  }
  func.func @transform_1(%arg0: i32, %arg1: i32) -> (i32, i32, i32) {
    %c0_i32 = arith.constant 0 : i32
    %c0_i32_0 = arith.constant 0 : i32
    %c0_i32_1 = arith.constant 0 : i32
    return %arg0, %c0_i32, %c0_i32_0 : i32, i32, i32
  }
  func.func @transform_2(%arg0: i32, %arg1: i32) -> (i32, i32, i32) {
    %c0_i32 = arith.constant 0 : i32
    %c0_i32_0 = arith.constant 0 : i32
    %c0_i32_1 = arith.constant 0 : i32
    return %arg0, %c0_i32, %c0_i32_0 : i32, i32, i32
  }
  func.func @transform_3(%arg0: i32, %arg1: i32) -> (i32, i32, i32) {
    %c0_i32 = arith.constant 0 : i32
    %c0_i32_0 = arith.constant 0 : i32
    return %arg0, %arg1, %c0_i32 : i32, i32, i32
  }
  func.func @transform_4(%arg0: i32, %arg1: i32) -> (i32, i32, i32) {
    %c0_i32 = arith.constant 0 : i32
    %c0_i32_0 = arith.constant 0 : i32
    return %arg0, %arg1, %c0_i32 : i32, i32, i32
  }
}

</mosaic_0001>

<bundles_post_ra>
// kernel: tpu_custom_call.1
= control target key start
LH: loop header
LB: loop body
LE: loop exit
PB: predicated region body
PF: predicated region fallthrough
CT: control target
= control target key end

     0   :  { %10 = vsyncpa [#allocation3], 0  ;;  %s1596_s0 = inlined_call_operand.vmem [shape: bf16[2,96,64], index: 0, kind: input, shape index: {}]   ;;  %s1597_s1 = inlined_call_operand.vmem [shape: bf16[2,128,64], index: 1, kind: input, shape index: {}]   ;;  %s1598_s2 = inlined_call_operand.vmem [shape: bf16[2,128,64], index: 2, kind: input, shape index: {}]   ;;  %s1599_s3 = inlined_call_operand.vmem [shape: f32[2,96,64], index: 3, kind: output, shape index: {0}]   ;;  %s1600_s4 = inlined_call_operand.hbm [shape: bf16[2,96,128], index: 4, kind: output, shape index: {1}]  }
   0x1   :  { %12 = vsyncpa [#allocation3 + $0x1], 0  ;;  %s1338_s15 = smov 0   ;;  %s1340_s16 = smov 0  }
   0x2   :  { %s1342_s17 = smov 0   ;;  %s1344_s18 = smov 0  }
   0x3   :  { %s1346_s19 = smov 0   ;;  %s1348_s20 = smov 0  }
   0x4 LB: > { %s940_s21 = sadd.s32 4294967295, %s1309_s20   ;;  %s941_s22 = sadd.s32 4294967294, %s1309_s20   ;;  %s1309_s20 = sphi %s1348_s20, %s18_s20   ;;  %s1305_s19 = sphi %s1346_s19, %s1607_s19   ;;  %s1301_s18 = sphi %s1344_s18, %s1606_s18   ;;  %s1297_s17 = sphi %s1342_s17, %s1605_s17   ;;  %s1293_s16 = sphi %s1340_s16, %s1604_s16   ;;  %s1289_s15 = sphi %s1338_s15, %s1603_s15  }
   0x5   : > { %s30_s23 = sadd.s32 1, %s1305_s19  ;;  %s147_s24 = sadd.s32 1, %s1297_s17 }
   0x6   : > { %p32_p0 = scmp.ge.s32.totalorder %s30_s23, 2  ;;  %p157_p1 = scmp.ne.s32.totalorder %s1297_s17, %s1293_s16 }
   0x7   : > { %p158_p2 = scmp.eq.s32.totalorder %s940_s21, 1  ;;  %p163_p3 = scmp.ne.s32.totalorder %s1293_s16, %s1289_s15 }
   0x8   : > { %s1609_s23 = smov (%p32_p0, %s30_s23), 0  ;;  %p164_p5 = scmp.eq.s32.totalorder %s941_s22, 1 }
   0x9   : > { %p1378_p4 = por %p158_p2, %p157_p1  ;;  %s142_s26 = ssub.s32 %s1305_s19, %s1609_s23 }
   0xa   : > { %p944_p6 = scmp.ge.s32.totalorder %s1309_s20, 1  ;;  %p145_p7 = scmp.eq.s32.totalorder %s142_s26, 0 }
   0xb   : > { %p1385_p8 = por %p164_p5, %p163_p3  ;;  %p211_p9 = scmp.lt.s32.totalorder %s1309_s20, 3 }
   0xc   : > { %s1391_s28 = scalar_select %p145_p7, %s1297_s17, %s147_s24  }
   0xd   : > { %p212_p10 = pnand %p944_p6, %p211_p9 }
   0xe   : > { %p261_p11 = scmp.lt.s32.totalorder (!%p212_p10), %s1301_s18, 1  ;;  %s257_s21 = sand.u32 (!%p212_p10), 1, %s1293_s16  }
   0xf   : > { %215 = sbr.rel (%p212_p10) target bundleno = 678 (0x2a6), region = 32  ;;  %s779_s9 = scalar_lea.sflag (!%p212_p10), [#allocation3], %s257_s21 }
  0x10   : > { %s1122_s22 = smul.u32 (!%p212_p10), 48, %s257_s21 }
  0x11   : > { %s1125_s26 = smul.u32 (!%p212_p10), 48, %s1301_s18 }
  0x12   : > { %s1523_s24 = scalar_lea.vmem (!%p212_p10), [#allocation2], %s1122_s22 }
  0x13   : > { %s796_s6 = scalar_lea.hbm (!%p212_p10), %s1600_s4, %s1125_s26 }
  0x14   : > { %s1395_s29 = scalar_select %p261_p11, %s1301_s18, 1  ;;  %vm389_vm0 = vcmask 523264   ;;  %v471_v52 = vlaneseq }
  0x15   : > { %s1251_s18 = scalar_lea.hbm %s1600_s4, 96 }
  0x16   : > { %s1024_s30 = sshll.u32 %s1395_s29, 6  ;;  %s1123_s8 = smul.u32 48, %s1395_s29  ;;  %v472_v53 = vand.u32 127, %v471_v52 }
  0x17   : > { %s1403_s7 = scalar_lea.vmem %s1597_s1, %s1024_s30  ;;  %s1480_s14 = scalar_lea.vmem %s1598_s2, %s1024_s30 }
  0x18   : > { %v1033_v0 = vld [vmem:[%s1403_s7 + $0x38] sm:$0xff]  ;;  %v1032_v2 = vld [vmem:[%s1403_s7 + $0x30] sm:$0xff]  ;;  %v1031_v4 = vld [vmem:[%s1403_s7 + $0x28] sm:$0xff]  ;;  %s1423_s11 = scalar_lea.vmem %s1596_s0, %s1123_s8  ;;  %vm473_vm1 = vcmp.lt.s32.totalorder %v472_v53, 96  ;;  %s799_s8 = sshll.u32 %s796_s6, 4  ;;  %s800_s8 = int_to_ptr.hbm [resolvable:$true] %s799_s8 }
  0x19   : > { %v430_v1 = vsel %vm389_vm0, %v1033_v0, 0  ;;  %v427_v3 = vsel %vm389_vm0, %v1032_v2, 0  ;;  %v424_v5 = vsel %vm389_vm0, %v1031_v4, 0  ;;  %v1030_v6 = vld [vmem:[%s1403_s7 + $0x20] sm:$0xff]  ;;  %v1029_v8 = vld [vmem:[%s1403_s7 + $0x18] sm:$0xff]  ;;  %v1028_v10 = vld [vmem:[%s1403_s7 + $0x10] sm:$0xff] }
  0x1a   : > { %432 = vmatpush.bf16.xpose.msra.mxu0 %v430_v1  ;;  %1106 = vmatpush.bf16.xpose.msra.mxu2 %v430_v1  ;;  %v421_v7 = vsel %vm389_vm0, %v1030_v6, 0  ;;  %v418_v9 = vsel %vm389_vm0, %v1029_v8, 0  ;;  %v415_v11 = vsel %vm389_vm0, %v1028_v10, 0  ;;  %v1027_v12 = vld [vmem:[%s1403_s7 + $0x8] sm:$0xff]  ;;  %v1043_v14 = vld [vmem:[%s1423_s11] sm:$0xff]   ;;  %v1097_v15 = vld [vmem:[%s1423_s11 + $0x10] sm:$0xff]  }
  0x1b   : > { %v412_v13 = vsel %vm389_vm0, %v1027_v12, 0  ;;  %v1026_v16 = vld [vmem:[%s1403_s7] sm:$0xff]  ;;  %v1044_v17 = vunpack.c.l.bf16 %v1043_v14  ;;  %v1045_v18 = vunpack.c.h.bf16 %v1043_v14  ;;  %v1052_v19 = vunpack.c.l.bf16 %v1097_v15  ;;  %v1096_v28 = vld [vmem:[%s1423_s11 + $0x8] sm:$0xff]   ;;  %v1098_v29 = vld [vmem:[%s1423_s11 + $0x18] sm:$0xff]   ;;  %s797_s7 = sshll.u32 %s1523_s24, 4  ;;  %s1245_s10 = sshra.s32 %s800_s8, 4  ;;  %s798_s7 = int_to_ptr.vmem [resolvable:$true] %s797_s7  ;;  %s1246_s10 = int_to_ptr.hbm [resolvable:$true] %s1245_s10 }
  0x1c   : > { %v1053_v20 = vunpack.c.h.bf16 %v1097_v15  ;;  %v409_v21 = vsel %vm389_vm0, %v1026_v16, 0  ;;  %v1048_v30 = vunpack.c.l.bf16 %v1096_v28  ;;  %v1049_v31 = vunpack.c.h.bf16 %v1096_v28  ;;  %v1099_v40 = vld [vmem:[%s1423_s11 + $0x20] sm:$0xff]   ;;  %v1100_v46 = vld [vmem:[%s1423_s11 + $0x28] sm:$0xff]   ;;  %s1247_s11 = scalar_lea.hbm %s1246_s10, 48  ;;  %p1252_p1 = scmp.lt.s32.totalorder %s1246_s10, %s1600_s4 }
  0x1d   : > { %v315_v22 = vmul.f32 0.125, %v1044_v17  ;;  %v316_v23 = vmul.f32 0.125, %v1045_v18  ;;  %v319_v24 = vmul.f32 0.125, %v1052_v19  ;;  %v1056_v32 = vunpack.c.l.bf16 %v1098_v29  ;;  %p1248_p12 = scmp.ne.s32.totalorder %s1246_s10, %s1247_s11  ;;  %p1253_p2 = scmp.lt.s32.totalorder %s1251_s18, %s1247_s11 }
  0x1e   : > { %v320_v25 = vmul.f32 0.125, %v1053_v20  ;;  %v1057_v33 = vunpack.c.h.bf16 %v1098_v29  ;;  %v317_v34 = vmul.f32 0.125, %v1048_v30  ;;  %v318_v35 = vmul.f32 0.125, %v1049_v31 }
  0x1f   : > { %v327_v26 = vpack.c.bf16 %v316_v23, %v315_v22  ;;  %v321_v36 = vmul.f32 0.125, %v1056_v32  ;;  %v1060_v41 = vunpack.c.l.bf16 %v1099_v40  ;;  %v1061_v42 = vunpack.c.h.bf16 %v1099_v40  ;;  %v1040_v40 = vld [vmem:[%s1480_s14 + $0x30] sm:$0xff]  ;;  %p1249_p13 = pnand %p1248_p12, %p1378_p4  ;;  %p1254_p3 = por %p1253_p2, %p1252_p1 }
  0x20   : > { %v329_v27 = vpack.c.bf16 %v320_v25, %v319_v24  ;;  %v322_v37 = vmul.f32 0.125, %v1057_v33  ;;  %v328_v38 = vpack.c.bf16 %v318_v35, %v317_v34  ;;  %v1064_v47 = vunpack.c.l.bf16 %v1100_v46 }
  0x21   : > { %v323_v43 = vmul.f32 0.125, %v1060_v41  ;;  %v324_v44 = vmul.f32 0.125, %v1061_v42  ;;  %v1065_v48 = vunpack.c.h.bf16 %v1100_v46  ;;  %p1250_p0 = pneg %p1249_p13 }
  0x22   : > { %433 = vmatpush.bf16.xpose.msra.mxu0 %v427_v3  ;;  %1107 = vmatpush.bf16.xpose.msra.mxu2 %v427_v3  ;;  %v330_v39 = vpack.c.bf16 %v322_v37, %v321_v36  ;;  %v325_v49 = vmul.f32 0.125, %v1064_v47 }
  0x23   : > { %v331_v45 = vpack.c.bf16 %v324_v44, %v323_v43  ;;  %v326_v50 = vmul.f32 0.125, %v1065_v48  ;;  %p1255_p5 = pnand %p1254_p3, %p1250_p0 }
  0x25   : > { %v332_v51 = vpack.c.bf16 %v326_v50, %v325_v49 }
  0x2a   : > { %434 = vmatpush.bf16.xpose.msra.mxu0 %v424_v5  ;;  %1108 = vmatpush.bf16.xpose.msra.mxu2 %v424_v5 }
  0x32   : > { %435 = vmatpush.bf16.xpose.msra.mxu0 %v421_v7  ;;  %1109 = vmatpush.bf16.xpose.msra.mxu2 %v421_v7 }
  0x3a   : > { %436 = vmatpush.bf16.xpose.msra.mxu0 %v418_v9  ;;  %1110 = vmatpush.bf16.xpose.msra.mxu2 %v418_v9 }
  0x42   : > { %437 = vmatpush.bf16.xpose.msra.mxu0 %v415_v11  ;;  %1111 = vmatpush.bf16.xpose.msra.mxu2 %v415_v11 }
  0x4a   : > { %438 = vmatpush.bf16.xpose.msra.mxu0 %v412_v13  ;;  %1112 = vmatpush.bf16.xpose.msra.mxu2 %v412_v13 }
  0x52   : > { %439 = vmatpush.bf16.xpose.msra.mxu0 %v409_v21  ;;  %1113 = vmatpush.bf16.xpose.msra.mxu2 %v409_v21 }
  0x59   : > { %983 = vmatmul.msk.bf16.vlgmr.msra.gmra.mxu0 %vm389_vm0, %v327_v26  ;;  %985 = vmatmul.msk.bf16.vlgmr.msra.gmra.mxu2 %vm389_vm0, %v329_v27 }
  0x69   : > { %984 = vmatmul.msk.bf16.gmra.mxu0 %vm389_vm0, %v328_v38  ;;  %986 = vmatmul.msk.bf16.gmra.mxu2 %vm389_vm0, %v330_v39  ;;  %v1041_v39 = vld [vmem:[%s1480_s14 + $0x38] sm:$0xff] }
  0x6a   : > { %718 = vmatpush.bf16.msra.mxu1 %v1041_v39  ;;  %1114 = vmatpush.bf16.msra.mxu3 %v1041_v39 }
  0x6e   : > { %719 = vmatpush.bf16.msra.mxu1 %v1040_v40  ;;  %1115 = vmatpush.bf16.msra.mxu3 %v1040_v40 }
  0x79   : > { %987 = vmatmul.msk.bf16.gmra.mxu2 %vm389_vm0, %v331_v45 }
  0x89   : > { %988 = vmatmul.msk.bf16.gmra.mxu2 %vm389_vm0, %v332_v51 }
  0xd6   : > { %v441_v54 = vpop.f32.mrf.mxu0 }
  0xd7   : > { %v474_v55 = vsel %vm473_vm1, %v441_v54, -inf }
  0xd8   : > { %486 = vmax.xlane.f32.xlu0 %v474_v55 }
  0xdc   : > { %v451_v56 = vpop.f32.mrf.mxu2 }
  0xdd   : > { %v478_v61 = vsel %vm473_vm1, %v451_v56, -inf }
  0xde   : > { %v443_v57 = vpop.f32.mrf.mxu0 }
  0xdf   : > { %v475_v58 = vsel %vm473_vm1, %v443_v57, -inf }
  0xe0   : > { %488 = vmax.xlane.f32.xlu0 %v475_v58 }
  0xe4   : > { %v453_v59 = vpop.f32.mrf.mxu2 }
  0xe5   : > { %v479_v3 = vsel %vm473_vm1, %v453_v59, -inf }
  0xe6   : > { %v446_v60 = vpop.f32.mrf.mxu0 }
  0xe7   : > { %v476_v62 = vsel %vm473_vm1, %v446_v60, -inf }
  0xe8   : > { %494 = vmax.xlane.f32.xlu0 %v478_v61  ;;  %490 = vmax.xlane.f32.xlu1 %v476_v62 }
  0xec   : > { %v456_v63 = vpop.f32.mrf.mxu2 }
  0xed   : > { %v1447_v6 = vsel %vm473_vm1, %v456_v63, -inf }
  0xee   : > { %v448_v0 = vpop.f32.mrf.mxu0 }
  0xef   : > { %v477_v1 = vsel %vm473_vm1, %v448_v0, -inf  ;;  %v1039_v0 = vld [vmem:[%s1480_s14 + $0x28] sm:$0xff] }
  0xf0   : > { %492 = vmax.xlane.f32.xlu1 %v477_v1  ;;  %720 = vmatpush.bf16.msra.mxu1 %v1039_v0 }
  0xf1   : > { %1116 = vmatpush.bf16.msra.mxu3 %v1039_v0 }
  0xf4   : > { %v458_v2 = vpop.f32.mrf.mxu2 }
  0xf5   : > { %v1456_v12 = vsel %vm473_vm1, %v458_v2, -inf  ;;  %v1037_v2 = vld [vmem:[%s1480_s14 + $0x18] sm:$0xff] }
  0xf8   : > { %496 = vmax.xlane.f32.xlu1 %v479_v3 }
  0xfc   : > { %v461_v4 = vpop.f32.mrf.mxu2 }
  0xfd   : > { %v482_v5 = vsel %vm473_vm1, %v461_v4, -inf  ;;  %v1035_v4 = vld [vmem:[%s1480_s14 + $0x8] sm:$0xff] }
  0xfe   : > { %502 = vmax.xlane.f32.xlu2 %v482_v5 }
 0x100   : > { %498 = vmax.xlane.f32.xlu1 %v1447_v6 }
 0x104   : > { %v463_v7 = vpop.f32.mrf.mxu2 }
 0x105   : > { %v483_v8 = vsel %vm473_vm1, %v463_v7, -inf }
 0x106   : > { %504 = vmax.xlane.f32.xlu2 %v483_v8 }
 0x10c   : > { %v466_v9 = vpop.f32.mrf.mxu2 }
 0x10d   : > { %v1452_v10 = vsel %vm473_vm1, %v466_v9, -inf }
 0x10e   : > { %506 = vmax.xlane.f32.xlu2 %v1452_v10 }
 0x114   : > { %v468_v11 = vpop.f32.mrf.mxu2 }
 0x115   : > { %v1459_v13 = vsel %vm473_vm1, %v468_v11, -inf }
 0x116   : > { %500 = vmax.xlane.f32.xlu2 %v1456_v12  ;;  %508 = vmax.xlane.f32.xlu0 %v1459_v13 }
 0x14b   : > { %v487_v14 = vpop.xlane.xlu0 %486 }
 0x14c   : > { %v510_v15 = vsub.f32 %v474_v55, %v487_v14 }
 0x14e   : > { %v522_v16 = vmul.f32 1.442695, %v510_v15 }
 0x150   : > { %1183 = vpow2.f32 %v522_v16 }
 0x153   : > { %v489_v17 = vpop.xlane.xlu0 %488 }
 0x154   : > { %v511_v18 = vsub.f32 %v475_v58, %v489_v17 }
 0x156   : > { %v1463_v19 = vpop.eup %1183  ;;  %v524_v20 = vmul.f32 1.442695, %v511_v18 }
 0x157   : > { %546 = vadd.xlane.f32.xlu0 %v1463_v19 }
 0x158   : > { %1185 = vpow2.f32 %v524_v20 }
 0x15b   : > { %v491_v21 = vpop.xlane.xlu1 %490  ;;  %v495_v27 = vpop.xlane.xlu0 %494 }
 0x15c   : > { %v512_v22 = vsub.f32 %v476_v62, %v491_v21  ;;  %v514_v30 = vsub.f32 %v478_v61, %v495_v27 }
 0x15e   : > { %v1466_v23 = vpop.eup %1185  ;;  %v526_v24 = vmul.f32 1.442695, %v512_v22  ;;  %v530_v31 = vmul.f32 1.442695, %v514_v30 }
 0x15f   : > { %548 = vadd.xlane.f32.xlu1 %v1466_v23 }
 0x160   : > { %1187 = vpow2.f32 %v526_v24 }
 0x163   : > { %v493_v25 = vpop.xlane.xlu1 %492 }
 0x164   : > { %v513_v26 = vsub.f32 %v477_v1, %v493_v25  ;;  %v1038_v1 = vld [vmem:[%s1480_s14 + $0x20] sm:$0xff] }
 0x165   : > { %721 = vmatpush.bf16.msra.mxu1 %v1038_v1  ;;  %1117 = vmatpush.bf16.msra.mxu3 %v1038_v1 }
 0x166   : > { %v528_v28 = vmul.f32 1.442695, %v513_v26  ;;  %v1469_v29 = vpop.eup %1187 }
 0x167   : > { %550 = vadd.xlane.f32.xlu2 %v1469_v29 }
 0x168   : > { %1189 = vpow2.f32 %v528_v28 }
 0x169   : > { %1191 = vpow2.f32 %v530_v31  ;;  %722 = vmatpush.bf16.msra.mxu1 %v1037_v2  ;;  %1118 = vmatpush.bf16.msra.mxu3 %v1037_v2 }
 0x16b   : > { %v497_v33 = vpop.xlane.xlu1 %496 }
 0x16c   : > { %v515_v37 = vsub.f32 %v479_v3, %v497_v33  ;;  %v1036_v3 = vld [vmem:[%s1480_s14 + $0x10] sm:$0xff] }
 0x16d   : > { %723 = vmatpush.bf16.msra.mxu1 %v1036_v3  ;;  %1119 = vmatpush.bf16.msra.mxu3 %v1036_v3 }
 0x16e   : > { %v1472_v32 = vpop.eup %1189  ;;  %v532_v41 = vmul.f32 1.442695, %v515_v37 }
 0x16f   : > { %552 = vadd.xlane.f32.xlu0 %v1472_v32  ;;  %v1482_v38 = vpop.eup %1191 }
 0x171   : > { %v503_v34 = vpop.xlane.xlu2 %502  ;;  %724 = vmatpush.bf16.msra.mxu1 %v1035_v4  ;;  %1120 = vmatpush.bf16.msra.mxu3 %v1035_v4 }
 0x172   : > { %v518_v35 = vsub.f32 %v482_v5, %v503_v34  ;;  %v1034_v5 = vld [vmem:[%s1480_s14] sm:$0xff] }
 0x173   : > { %v499_v43 = vpop.xlane.xlu1 %498 }
 0x174   : > { %v538_v36 = vmul.f32 1.442695, %v518_v35  ;;  %v516_v47 = vsub.f32 %v1447_v6, %v499_v43 }
 0x175   : > { %725 = vmatpush.bf16.msra.mxu1 %v1034_v5  ;;  %1121 = vmatpush.bf16.msra.mxu3 %v1034_v5 }
 0x176   : > { %1193 = vpow2.f32 %v538_v36  ;;  %v534_v48 = vmul.f32 1.442695, %v516_v47 }
 0x177   : > { %554 = vadd.xlane.f32.xlu0 %v1482_v38  ;;  %1195 = vpow2.f32 %v532_v41 }
 0x179   : > { %v505_v42 = vpop.xlane.xlu2 %504 }
 0x17a   : > { %v519_v44 = vsub.f32 %v483_v8, %v505_v42 }
 0x17c   : > { %v1487_v45 = vpop.eup %1193  ;;  %v540_v46 = vmul.f32 1.442695, %v519_v44 }
 0x17d   : > { %562 = vadd.xlane.f32.xlu1 %v1487_v45  ;;  %v1492_v51 = vpop.eup %1195 }
 0x17e   : > { %1197 = vpow2.f32 %v540_v46 }
 0x17f   : > { %1199 = vpow2.f32 %v534_v48 }
 0x181   : > { %v507_v49 = vpop.xlane.xlu2 %506 }
 0x182   : > { %v520_v50 = vsub.f32 %v1452_v10, %v507_v49 }
 0x184   : > { %v1494_v52 = vpop.eup %1197  ;;  %v542_v53 = vmul.f32 1.442695, %v520_v50 }
 0x185   : > { %564 = vadd.xlane.f32.xlu2 %v1494_v52  ;;  %556 = vadd.xlane.f32.xlu1 %v1492_v51  ;;  %v1500_v58 = vpop.eup %1199 }
 0x186   : > { %1201 = vpow2.f32 %v542_v53 }
 0x189   : > { %v501_v54 = vpop.xlane.xlu2 %500  ;;  %v509_v55 = vpop.xlane.xlu0 %508 }
 0x18a   : > { %v517_v56 = vsub.f32 %v1456_v12, %v501_v54  ;;  %v521_v57 = vsub.f32 %v1459_v13, %v509_v55 }
 0x18c   : > { %v1502_v59 = vpop.eup %1201  ;;  %v536_v60 = vmul.f32 1.442695, %v517_v56  ;;  %v544_v61 = vmul.f32 1.442695, %v521_v57 }
 0x18d   : > { %566 = vadd.xlane.f32.xlu2 %v1502_v59  ;;  %558 = vadd.xlane.f32.xlu1 %v1500_v58 }
 0x18e   : > { %1203 = vpow2.f32 %v536_v60 }
 0x18f   : > { %1205 = vpow2.f32 %v544_v61 }
 0x194   : > { %v1506_v62 = vpop.eup %1203 }
 0x195   : > { %v1508_v63 = vpop.eup %1205  ;;  %560 = vadd.xlane.f32.xlu2 %v1506_v62 }
 0x196   : > { %568 = vadd.xlane.f32.xlu0 %v1508_v63 }
 0x1ca   : > { %v547_v6 = vpop.xlane.xlu0 %546 }
 0x1cb   : > { %1207 = vrcp.f32 %v547_v6 }
 0x1d1   : > { %v1208_v8 = vpop.eup %1207 }
 0x1d2   : > { %v549_v7 = vpop.xlane.xlu1 %548  ;;  %v582_v9 = vmul.f32 %v1208_v8, %v1463_v19 }
 0x1d3   : > { %1209 = vrcp.f32 %v549_v7 }
 0x1d4   : > { %v594_v12 = vpack.c.bf16 %v582_v9, %v582_v9 }
 0x1d6   : > { %v646_v16 = vunpack.c.l.b16 %v594_v12 }
 0x1d9   : > { %v1210_v10 = vpop.eup %1209 }
 0x1da   : > { %v583_v11 = vmul.f32 %v1210_v10, %v1466_v23  ;;  %v551_v13 = vpop.xlane.xlu2 %550 }
 0x1db   : > { %1211 = vrcp.f32 %v551_v13 }
 0x1dc   : > { %v595_v14 = vpack.c.bf16 %v583_v11, %v583_v11  ;;  %v1069_v15 = vpack.c.bf16 %v583_v11, %v582_v9 }
 0x1de   : > { %1070 = vst [vmem:[%s1523_s24] sm:$0xff] %v1069_v15   ;;  %v647_v17 = vunpack.c.l.b16 %v595_v14 }
 0x1e0   : > { %v658_v18 = vpack.c.b16 %v647_v17, %v646_v16 }
 0x1e1   : > { %v1212_v19 = vpop.eup %1211 }
 0x1e2   : > { %v553_v20 = vpop.xlane.xlu0 %552  ;;  %726 = vmatmul.bf16.vlgmr.msra.gmra.mxu1 %v658_v18  ;;  %v584_v21 = vmul.f32 %v1212_v19, %v1469_v29 }
 0x1e3   : > { %1213 = vrcp.f32 %v553_v20 }
 0x1e4   : > { %v596_v24 = vpack.c.bf16 %v584_v21, %v584_v21 }
 0x1e6   : > { %v648_v27 = vunpack.c.l.b16 %v596_v24 }
 0x1e9   : > { %v1214_v22 = vpop.eup %1213 }
 0x1ea   : > { %v585_v23 = vmul.f32 %v1214_v22, %v1472_v32  ;;  %v555_v33 = vpop.xlane.xlu0 %554 }
 0x1ec   : > { %v597_v25 = vpack.c.bf16 %v585_v23, %v585_v23  ;;  %v1074_v26 = vpack.c.bf16 %v585_v23, %v584_v21 }
 0x1ee   : > { %1101 = vst [vmem:[%s1523_s24 + $0x8] sm:$0xff] %v1074_v26   ;;  %v649_v28 = vunpack.c.l.b16 %v597_v25 }
 0x1f0   : > { %v563_v30 = vpop.xlane.xlu1 %562  ;;  %v659_v31 = vpack.c.b16 %v649_v28, %v648_v27 }
 0x1f1   : > { %1215 = vrcp.f32 %v563_v30 }
 0x1f2   : > { %731 = vmatmul.bf16.gmra.mxu1 %v659_v31  ;;  %1217 = vrcp.f32 %v555_v33 }
 0x1f7   : > { %v1216_v36 = vpop.eup %1215 }
 0x1f8   : > { %v565_v34 = vpop.xlane.xlu2 %564  ;;  %v557_v35 = vpop.xlane.xlu1 %556  ;;  %v590_v32 = vmul.f32 %v1216_v36, %v1487_v45 }
 0x1f9   : > { %1219 = vrcp.f32 %v565_v34  ;;  %v1218_v29 = vpop.eup %1217 }
 0x1fa   : > { %1221 = vrcp.f32 %v557_v35  ;;  %v586_v37 = vmul.f32 %v1218_v29, %v1482_v38  ;;  %v602_v44 = vpack.c.bf16 %v590_v32, %v590_v32 }
 0x1fc   : > { %v598_v47 = vpack.c.bf16 %v586_v37, %v586_v37  ;;  %v654_v45 = vunpack.c.l.b16 %v602_v44 }
 0x1fe   : > { %v650_v54 = vunpack.c.l.b16 %v598_v47 }
 0x1ff   : > { %v1220_v39 = vpop.eup %1219 }
 0x200   : > { %v1222_v40 = vpop.eup %1221  ;;  %v567_v41 = vpop.xlane.xlu2 %566  ;;  %v591_v43 = vmul.f32 %v1220_v39, %v1494_v52 }
 0x201   : > { %v559_v42 = vpop.xlane.xlu1 %558  ;;  %v587_v46 = vmul.f32 %v1222_v40, %v1492_v51 }
 0x202   : > { %v603_v48 = vpack.c.bf16 %v591_v43, %v591_v43  ;;  %v1089_v49 = vpack.c.bf16 %v591_v43, %v590_v32  ;;  %1223 = vrcp.f32 %v559_v42 }
 0x203   : > { %v599_v50 = vpack.c.bf16 %v587_v46, %v587_v46  ;;  %v1079_v53 = vpack.c.bf16 %v587_v46, %v586_v37  ;;  %1225 = vrcp.f32 %v567_v41 }
 0x204   : > { %1104 = vst [vmem:[%s1523_s24 + $0x20] sm:$0xff] %v1089_v49   ;;  %v655_v38 = vunpack.c.l.b16 %v603_v48 }
 0x205   : > { %1102 = vst [vmem:[%s1523_s24 + $0x10] sm:$0xff] %v1079_v53   ;;  %v651_v55 = vunpack.c.l.b16 %v599_v50 }
 0x206   : > { %v662_v56 = vpack.c.b16 %v655_v38, %v654_v45 }
 0x207   : > { %v660_v57 = vpack.c.b16 %v651_v55, %v650_v54 }
 0x208   : > { %v561_v60 = vpop.xlane.xlu2 %560  ;;  %746 = vmatmul.bf16.vlgmr.msra.gmra.mxu3 %v662_v56  ;;  %v1224_v52 = vpop.eup %1223 }
 0x209   : > { %1227 = vrcp.f32 %v561_v60  ;;  %v569_v51 = vpop.xlane.xlu0 %568  ;;  %736 = vmatmul.bf16.gmra.mxu1 %v660_v57  ;;  %v1226_v61 = vpop.eup %1225  ;;  %v588_v0 = vmul.f32 %v1224_v52, %v1500_v58 }
 0x20a   : > { %1229 = vrcp.f32 %v569_v51  ;;  %v592_v1 = vmul.f32 %v1226_v61, %v1502_v59 }
 0x20b   : > { %v600_v5 = vpack.c.bf16 %v588_v0, %v588_v0 }
 0x20c   : > { %v604_v7 = vpack.c.bf16 %v592_v1, %v592_v1 }
 0x20d   : > { %v652_v12 = vunpack.c.l.b16 %v600_v5 }
 0x20e   : > { %v656_v59 = vunpack.c.l.b16 %v604_v7 }
 0x20f   : > { %v1228_v2 = vpop.eup %1227 }
 0x210   : > { %v1230_v3 = vpop.eup %1229  ;;  %v589_v4 = vmul.f32 %v1228_v2, %v1506_v62 }
 0x211   : > { %v593_v6 = vmul.f32 %v1230_v3, %v1508_v63 }
 0x212   : > { %v601_v8 = vpack.c.bf16 %v589_v4, %v589_v4  ;;  %v1084_v9 = vpack.c.bf16 %v589_v4, %v588_v0 }
 0x213   : > { %v605_v10 = vpack.c.bf16 %v593_v6, %v593_v6  ;;  %v1094_v11 = vpack.c.bf16 %v593_v6, %v592_v1 }
 0x214   : > { %1103 = vst [vmem:[%s1523_s24 + $0x18] sm:$0xff] %v1084_v9   ;;  %v653_v58 = vunpack.c.l.b16 %v601_v8 }
 0x215   : > { %1105 = vst [vmem:[%s1523_s24 + $0x28] sm:$0xff] %v1094_v11   ;;  %v657_v13 = vunpack.c.l.b16 %v605_v10 }
 0x216   : > { %v661_v14 = vpack.c.b16 %v653_v58, %v652_v12 }
 0x217   : > { %v663_v62 = vpack.c.b16 %v657_v13, %v656_v59 }
 0x219   : > { %741 = vmatmul.bf16.gmra.mxu1 %v661_v14  ;;  %751 = vmatmul.bf16.gmra.mxu3 %v663_v62 }
 0x21a   : > { %1258 = shalt.err (!%p1255_p5)
}
 0x21b   : > { %s1311_s21 = smov 64   ;;  %s1312_s24 = smov 4  }
 0x21c   : > { %1126 = dma.vmem_to_hbm [thread:$0]  (%p1378_p4), %s798_s7, 768, %s800_s8, %s779_s9, %s1311_s21, %s1311_s21, %s1312_s24  }
 0x21d   : > { %s1124_s26 = smul.u32 96, %s1395_s29 }
 0x21f   : > { %s288_s6 = scalar_lea.vmem %s1599_s3, %s1124_s26 }
 0x25f   : > { %v727_v63 = vpop.f32.mrf.mxu1 }
 0x260   : > { %757 = vst.msk [vmem:[%s288_s6] sm:$0xff] %vm389_vm0, %v727_v63 }
 0x267   : > { %v729_v15 = vpop.f32.mrf.mxu1 }
 0x268   : > { %758 = vst.msk [vmem:[%s288_s6 + $0x8] sm:$0xff] %vm389_vm0, %v729_v15 }
 0x26f   : > { %v732_v16 = vpop.f32.mrf.mxu1 }
 0x270   : > { %759 = vst.msk [vmem:[%s288_s6 + $0x10] sm:$0xff] %vm389_vm0, %v732_v16 }
 0x277   : > { %v734_v17 = vpop.f32.mrf.mxu1 }
 0x278   : > { %760 = vst.msk [vmem:[%s288_s6 + $0x18] sm:$0xff] %vm389_vm0, %v734_v17 }
 0x286   : > { %v737_v18 = vpop.f32.mrf.mxu1 }
 0x287   : > { %761 = vst.msk [vmem:[%s288_s6 + $0x20] sm:$0xff] %vm389_vm0, %v737_v18 }
 0x28b   : > { %v747_v20 = vpop.f32.mrf.mxu3 }
 0x28c   : > { %765 = vst.msk [vmem:[%s288_s6 + $0x40] sm:$0xff] %vm389_vm0, %v747_v20 }
 0x28e   : > { %v739_v19 = vpop.f32.mrf.mxu1 }
 0x28f   : > { %762 = vst.msk [vmem:[%s288_s6 + $0x28] sm:$0xff] %vm389_vm0, %v739_v19 }
 0x293   : > { %v749_v21 = vpop.f32.mrf.mxu3 }
 0x294   : > { %766 = vst.msk [vmem:[%s288_s6 + $0x48] sm:$0xff] %vm389_vm0, %v749_v21 }
 0x296   : > { %v742_v22 = vpop.f32.mrf.mxu1 }
 0x297   : > { %763 = vst.msk [vmem:[%s288_s6 + $0x30] sm:$0xff] %vm389_vm0, %v742_v22 }
 0x29c   : > { %v752_v23 = vpop.f32.mrf.mxu3 }
 0x29d   : > { %767 = vst.msk [vmem:[%s288_s6 + $0x50] sm:$0xff] %vm389_vm0, %v752_v23 }
 0x29e   : > { %v744_v24 = vpop.f32.mrf.mxu1 }
 0x29f   : > { %764 = vst.msk [vmem:[%s288_s6 + $0x38] sm:$0xff] %vm389_vm0, %v744_v24 }
 0x2a4   : > { %v754_v25 = vpop.f32.mrf.mxu3 }
 0x2a5   : > { %768 = vst.msk [vmem:[%s288_s6 + $0x58] sm:$0xff] %vm389_vm0, %v754_v25 }
 0x2a6 PF: > { %p1132_p4 = scmp.ge.s32.totalorder %s1309_s20, 2  ;;  %s826_s25 = sand.u32 1, %s1289_s15  }
 0x2a7   : > { %s827_s29 = scalar_lea.sflag [#allocation3], %s826_s25 }
 0x2a8   : > { %p1129_p6 = pnand %p1132_p4, %p1385_p8 }
 0x2aa   : > { %p1130_p7 = pneg %p1129_p6 }
 0x2ac   : > { %1284 = dma.done.wait (%p1130_p7), %s827_s29, 768  }
 0x2ad   : > { %1286 = vsyncadd (%p1130_p7), %s827_s29, 4294966528  ;;  %s18_s20 = sadd.s32 1, %s1309_s20   ;;  %s1603_s15 = smov %s1293_s16 }
 0x2ae   : > { %p15_p9 = scmp.ge.s32.totalorder %s18_s20, 4   ;;  %s1604_s16 = smov %s1297_s17 }
 0x2af   : > { %s1605_s17 = smov %s1391_s28  ;;  %s1606_s18 = smov %s1305_s19 }
 0x2b0   : > { %s1607_s19 = smov %s1609_s23  ;;  %17 = sbr.rel (!%p15_p9) target bundleno = 4 (0x4), region = 85 }
 0x2b5   :  { %833 = vsyncpa [#allocation3], 1 }
 0x2b6   :  { %835 = vsyncpa [#allocation3 + $0x1], 1 }

</bundles_post_ra>
